<compile_context>
chip_gen: v7x
topology: tpu7x:2x2x1
jax: 0.10.0
libtpu: 0.0.40
codegen_flags: <defaults>
</compile_context>

<pallas_src>
import functools
import math

import jax
import jax.numpy as jnp
from jax.experimental import pallas as pl
from jax.experimental.pallas import tpu as pltpu


def _fwa_kernel(x_ref, wt_ref, b_ref, idx_ref, out_ref, *, g, hidden):
    """x_ref/out_ref: (tb, g*hidden); wt_ref: (hidden, F); b_ref: (1, F);
    idx_ref: (tb, g) int32.  Each folded row holds g original batch rows."""
    wt = wt_ref[...]                                       # (H, F) resident in VMEM
    b = b_ref[...]                                         # (1, F) resident
    idx = idx_ref[...]                                     # (tb, g)
    # Hoisted out of the segment loop (constant shape): feature-id iota.
    col = jax.lax.broadcasted_iota(
        jnp.int32, (x_ref.shape[0], wt_ref.shape[1]), 1)   # (tb, F)

    # Static (fully unrolled) loop over the g row-segments folded into lanes.
    for j in range(g):
        lo = j * hidden
        xj = x_ref[:, lo:lo + hidden]                      # (tb, H)

        # logits = x @ W^T + b on the MXU (W already transposed in the wrapper).
        logits = jax.lax.dot_general(
            xj, wt,
            dimension_numbers=(((1,), (0,)), ((), ())),
            preferred_element_type=jnp.float32,
            precision=jax.lax.Precision.HIGHEST,
        ) + b                                              # (tb, F)

        # Row-wise numerically stable softmax fused with the one-hot gather:
        #   sel = exp(logit[idx] - m) / sum(exp(logits - m))
        # (never materializes the normalized attn matrix).
        m = jnp.max(logits, axis=-1, keepdims=True)
        e = jnp.exp(logits - m)
        denom = jnp.sum(e, axis=-1, keepdims=True)
        num = jnp.sum(jnp.where(col == idx[:, j:j + 1], e, 0.0),
                      axis=-1, keepdims=True)
        sel = num / denom                                  # (tb, 1), exact divide

        out_ref[:, lo:lo + hidden] = (sel * xj).astype(out_ref.dtype)


def _fold_factor(batch: int, hidden: int) -> int:
    """Rows folded into the lane dim so the HBM tiles are lane-dense when H<128."""
    if hidden >= 128 or hidden <= 0 or 128 % hidden != 0:
        return 1
    return max(1, math.gcd(batch, 128 // hidden))


def _choose_tb(batch: int, row_width: int) -> int:
    """Rows per batch tile: multiple of 8 (f32 sublane), ~8 MiB per x tile,
    capped around batch/4 so megacore still gets >=2 steps per TensorCore."""
    if batch <= 8:
        return batch                                   # single block == full dim
    bytes_per_row = 4 * max(row_width, 128)            # account for lane padding
    tb = max(8, (8 * 1024 * 1024) // bytes_per_row)
    quarter = max(8, ((batch // 4) // 8) * 8)
    tb = min(tb, quarter, batch)
    return max(8, (tb // 8) * 8)


def feature_wise_attention(x, weight, bias, feature_idx):
    """x: (B, H) f32; weight: (F, H) (PyTorch Linear layout); bias: (F,);
    feature_idx: (B,) int.  Returns (B, H) in x's dtype."""
    B, H = x.shape
    F, H_w = weight.shape
    assert H_w == H and bias.shape == (F,)

    g = _fold_factor(B, H)
    Bf = B // g
    W = g * H                                          # lane width of a folded row

    x_f = x.reshape(Bf, W)                             # contiguous reshape: free under jit
    idx_f = feature_idx.astype(jnp.int32).reshape(Bf, g)
    wt = weight.T                                      # (H, F), transposed once (tiny)
    b2 = bias.reshape(1, F)

    tb = _choose_tb(Bf, W)
    grid = (pl.cdiv(Bf, tb),)                          # ragged tail handled by Pallas

    kernel = functools.partial(_fwa_kernel, g=g, hidden=H)

    out = pl.pallas_call(
        kernel,
        out_shape=jax.ShapeDtypeStruct((Bf, W), x.dtype),
        grid_spec=pltpu.PrefetchScalarGridSpec(
            num_scalar_prefetch=0,
            grid=grid,
            in_specs=[
                pl.BlockSpec((tb, W), lambda i: (i, 0)),   # x tile (double-buffered)
                pl.BlockSpec((H, F), lambda i: (0, 0)),    # W^T resident across steps
                pl.BlockSpec((1, F), lambda i: (0, 0)),    # bias resident
                pl.BlockSpec((tb, g), lambda i: (i, 0)),   # feature_idx tile
            ],
            out_specs=pl.BlockSpec((tb, W), lambda i: (i, 0)),
        ),
        compiler_params=pltpu.CompilerParams(
            dimension_semantics=("parallel",),             # megacore sharding
            vmem_limit_bytes=48 * 1024 * 1024,
        ),
        cost_estimate=pl.CostEstimate(
            flops=2 * B * H * F,
            transcendentals=B * F,
            bytes_accessed=2 * B * H * 4 + H * F * 4 + B * 4 + F * 4,
        ),
    )(x_f, wt, b2, idx_f)

    return out.reshape(B, H)


def _reference(x, weight, bias, feature_idx):
    logits = jnp.dot(x, weight.T, precision=jax.lax.Precision.HIGHEST) + bias
    attn = jax.nn.softmax(logits, axis=-1)
    sel = attn[jnp.arange(x.shape[0]), feature_idx]
    return sel[:, None] * x


def _make_inputs(key, batch, hidden, features):
    kx, kw, kb, ki = jax.random.split(key, 4)
    bound = 1.0 / (hidden ** 0.5)
    x = jax.random.normal(kx, (batch, hidden), dtype=jnp.float32)
    # nn.Linear(hidden, features): weight (features, hidden), bias (features,)
    w = jax.random.uniform(kw, (features, hidden), minval=-bound, maxval=bound,
                           dtype=jnp.float32)
    b = jax.random.uniform(kb, (features,), minval=-bound, maxval=bound,
                           dtype=jnp.float32)
    idx = jax.random.randint(ki, (batch,), 0, features, dtype=jnp.int32)
    return x, w, b, idx


if __name__ == "__main__":
    fwa = jax.jit(feature_wise_attention)
    key = jax.random.PRNGKey(0)

    # Primary case uses the module's natural small shapes (B=2, H=32, F=16).
    # Extra cases exercise: batch-fold + multi-step grid, the no-fold H<128
    # fallback, and a large batch with H>=128 and a ragged last tile.
    cases = [(2, 32, 16), (64, 32, 16), (7, 32, 16), (1000, 256, 16)]
    for i, (B, H, F) in enumerate(cases):
        x, w, b, idx = _make_inputs(jax.random.fold_in(key, i), B, H, F)
        out = jax.block_until_ready(fwa(x, w, b, idx))
        ref = _reference(x, w, b, idx)
        assert out.shape == (B, H)
        assert jnp.allclose(out, ref, atol=1e-4, rtol=1e-4), \
            f"mismatch vs reference at (B,H,F)={(B, H, F)}"

    print("KERNEL_OK")
</pallas_src>

<mosaic_0001>
module attributes {stable_mosaic.version = 11 : i64} {
  func.func @_fwa_kernel(%arg0: i32, %arg1: memref<1x64xf32, #tpu.memory_space<vmem>>, %arg2: memref<32x16xf32, #tpu.memory_space<vmem>>, %arg3: memref<1x16xf32, #tpu.memory_space<vmem>>, %arg4: memref<1x2xi32, #tpu.memory_space<vmem>>, %arg5: memref<1x64xf32, #tpu.memory_space<vmem>>) attributes {dimension_semantics = [#tpu.dimension_semantics<parallel>], iteration_bounds = array<i64: 1>, scalar_prefetch = 0 : i64, scratch_operands = 0 : i64, tpu.core_type = #tpu.core_type<tc>, window_params = [{transform_indices = @transform_0, window_bounds = array<i64: 1, 64>}, {pipeline_mode = #tpu.pipeline_mode<synchronous>, transform_indices = @transform_1, window_bounds = array<i64: 32, 16>}, {pipeline_mode = #tpu.pipeline_mode<synchronous>, transform_indices = @transform_2, window_bounds = array<i64: 1, 16>}, {transform_indices = @transform_3, window_bounds = array<i64: 1, 2>}, {transform_indices = @transform_4, window_bounds = array<i64: 1, 64>}]} {
    %c0 = arith.constant 0 : index
    %c0_0 = arith.constant 0 : index
    %0 = vector.load %arg2[%c0, %c0_0] : memref<32x16xf32, #tpu.memory_space<vmem>>, vector<32x16xf32>
    %c0_1 = arith.constant 0 : index
    %c0_2 = arith.constant 0 : index
    %1 = vector.load %arg3[%c0_1, %c0_2] : memref<1x16xf32, #tpu.memory_space<vmem>>, vector<1x16xf32>
    %c0_3 = arith.constant 0 : index
    %c0_4 = arith.constant 0 : index
    %2 = vector.load %arg4[%c0_3, %c0_4] : memref<1x2xi32, #tpu.memory_space<vmem>>, vector<1x2xi32>
    %3 = tpu.iota {dimensions = array<i32: 1>} : vector<1x16xi32>
    %c0_5 = arith.constant 0 : index
    %c0_6 = arith.constant 0 : index
    %4 = vector.load %arg1[%c0_5, %c0_6] : memref<1x64xf32, #tpu.memory_space<vmem>>, vector<1x32xf32>
    %cst = arith.constant dense<0.000000e+00> : vector<1x16xf32>
    %5 = tpu.matmul %4, %0, %cst {dimension_numbers = #tpu.dot_dimension_numbers<[1], [0], [0], [1], [0, 0, 1, 1], [], []>, precision = #tpu.contract_precision<fp32>} : vector<1x32xf32>, vector<32x16xf32>, vector<1x16xf32> -> vector<1x16xf32>
    %6 = arith.addf %5, %1 : vector<1x16xf32>
    %cst_7 = arith.constant dense<0xFF800000> : vector<1xf32>
    %7 = vector.multi_reduction <maximumf>, %6, %cst_7 [1] : vector<1x16xf32> to vector<1xf32>
    %8 = vector.shape_cast %7 : vector<1xf32> to vector<1x1xf32>
    %9 = vector.broadcast %8 : vector<1x1xf32> to vector<1x16xf32>
    %10 = arith.subf %6, %9 : vector<1x16xf32>
    %11 = math.exp %10 : vector<1x16xf32>
    %cst_8 = arith.constant dense<0.000000e+00> : vector<1xf32>
    %12 = vector.multi_reduction <add>, %11, %cst_8 [1] : vector<1x16xf32> to vector<1xf32>
    %13 = vector.shape_cast %12 : vector<1xf32> to vector<1x1xf32>
    %14 = vector.extract_strided_slice %2 {offsets = [0, 0], sizes = [1, 1], strides = [1, 1]} : vector<1x2xi32> to vector<1x1xi32>
    %15 = vector.broadcast %14 : vector<1x1xi32> to vector<1x16xi32>
    %16 = arith.cmpi eq, %3, %15 : vector<1x16xi32>
    %cst_9 = arith.constant 0.000000e+00 : f32
    %17 = vector.broadcast %cst_9 : f32 to vector<1x16xf32>
    %18 = arith.select %16, %11, %17 : vector<1x16xi1>, vector<1x16xf32>
    %cst_10 = arith.constant dense<0.000000e+00> : vector<1xf32>
    %19 = vector.multi_reduction <add>, %18, %cst_10 [1] : vector<1x16xf32> to vector<1xf32>
    %20 = vector.shape_cast %19 : vector<1xf32> to vector<1x1xf32>
    %21 = arith.divf %20, %13 : vector<1x1xf32>
    %22 = vector.broadcast %21 : vector<1x1xf32> to vector<1x32xf32>
    %23 = arith.mulf %22, %4 : vector<1x32xf32>
    %c0_11 = arith.constant 0 : index
    %c0_12 = arith.constant 0 : index
    %24 = vector.load %arg5[%c0_11, %c0_12] : memref<1x64xf32, #tpu.memory_space<vmem>>, vector<1x32xf32>
    tpu.vector_store %arg5[%c0_11, %c0_12], %23 {strides = array<i32>} : memref<1x64xf32, #tpu.memory_space<vmem>>, vector<1x32xf32>,
    %c0_13 = arith.constant 0 : index
    %c32 = arith.constant 32 : index
    %25 = vector.load %arg1[%c0_13, %c32] : memref<1x64xf32, #tpu.memory_space<vmem>>, vector<1x32xf32>
    %cst_14 = arith.constant dense<0.000000e+00> : vector<1x16xf32>
    %26 = tpu.matmul %25, %0, %cst_14 {dimension_numbers = #tpu.dot_dimension_numbers<[1], [0], [0], [1], [0, 0, 1, 1], [], []>, precision = #tpu.contract_precision<fp32>} : vector<1x32xf32>, vector<32x16xf32>, vector<1x16xf32> -> vector<1x16xf32>
    %27 = arith.addf %26, %1 : vector<1x16xf32>
    %cst_15 = arith.constant dense<0xFF800000> : vector<1xf32>
    %28 = vector.multi_reduction <maximumf>, %27, %cst_15 [1] : vector<1x16xf32> to vector<1xf32>
    %29 = vector.shape_cast %28 : vector<1xf32> to vector<1x1xf32>
    %30 = vector.broadcast %29 : vector<1x1xf32> to vector<1x16xf32>
    %31 = arith.subf %27, %30 : vector<1x16xf32>
    %32 = math.exp %31 : vector<1x16xf32>
    %cst_16 = arith.constant dense<0.000000e+00> : vector<1xf32>
    %33 = vector.multi_reduction <add>, %32, %cst_16 [1] : vector<1x16xf32> to vector<1xf32>
    %34 = vector.shape_cast %33 : vector<1xf32> to vector<1x1xf32>
    %35 = vector.extract_strided_slice %2 {offsets = [0, 1], sizes = [1, 1], strides = [1, 1]} : vector<1x2xi32> to vector<1x1xi32>
    %36 = vector.broadcast %35 : vector<1x1xi32> to vector<1x16xi32>
    %37 = arith.cmpi eq, %3, %36 : vector<1x16xi32>
    %cst_17 = arith.constant 0.000000e+00 : f32
    %38 = vector.broadcast %cst_17 : f32 to vector<1x16xf32>
    %39 = arith.select %37, %32, %38 : vector<1x16xi1>, vector<1x16xf32>
    %cst_18 = arith.constant dense<0.000000e+00> : vector<1xf32>
    %40 = vector.multi_reduction <add>, %39, %cst_18 [1] : vector<1x16xf32> to vector<1xf32>
    %41 = vector.shape_cast %40 : vector<1xf32> to vector<1x1xf32>
    %42 = arith.divf %41, %34 : vector<1x1xf32>
    %43 = vector.broadcast %42 : vector<1x1xf32> to vector<1x32xf32>
    %44 = arith.mulf %43, %25 : vector<1x32xf32>
    %c0_19 = arith.constant 0 : index
    %c32_20 = arith.constant 32 : index
    %45 = vector.load %arg5[%c0_19, %c32_20] : memref<1x64xf32, #tpu.memory_space<vmem>>, vector<1x32xf32>
    tpu.vector_store %arg5[%c0_19, %c32_20], %44 {strides = array<i32>} : memref<1x64xf32, #tpu.memory_space<vmem>>, vector<1x32xf32>,
    return
  }
  func.func @transform_0(%arg0: i32) -> (i32, i32) {
    %c0_i32 = arith.constant 0 : i32
    %c0_i32_0 = arith.constant 0 : i32
    return %arg0, %c0_i32 : i32, i32
  }
  func.func @transform_1(%arg0: i32) -> (i32, i32) {
    %c0_i32 = arith.constant 0 : i32
    %c0_i32_0 = arith.constant 0 : i32
    %c0_i32_1 = arith.constant 0 : i32
    return %c0_i32, %c0_i32_0 : i32, i32
  }
  func.func @transform_2(%arg0: i32) -> (i32, i32) {
    %c0_i32 = arith.constant 0 : i32
    %c0_i32_0 = arith.constant 0 : i32
    %c0_i32_1 = arith.constant 0 : i32
    return %c0_i32, %c0_i32_0 : i32, i32
  }
  func.func @transform_3(%arg0: i32) -> (i32, i32) {
    %c0_i32 = arith.constant 0 : i32
    %c0_i32_0 = arith.constant 0 : i32
    return %arg0, %c0_i32 : i32, i32
  }
  func.func @transform_4(%arg0: i32) -> (i32, i32) {
    %c0_i32 = arith.constant 0 : i32
    %c0_i32_0 = arith.constant 0 : i32
    return %arg0, %c0_i32 : i32, i32
  }
}

</mosaic_0001>

<bundles_post_ra>
// kernel: feature_wise_attention.1
= control target key start
LH: loop header
LB: loop body
LE: loop exit
PB: predicated region body
PF: predicated region fallthrough
CT: control target
= control target key end

     0   :  { %vm26_vm0 = vcmask 261120   ;;  %v1377_v2 = vmov 0.0|0.0   ;;  %vm1378_vm1 = vmmov 0   ;;  %v1379_v4 = vmov 0.0   ;;  %s1380_s21 = smov 96   ;;  %s1527_s0 = inlined_call_operand.vmem [shape: f32[1,64], index: 0, kind: input, shape index: {}]   ;;  %s1528_s1 = inlined_call_operand.vmem [shape: f32[32,16], index: 1, kind: input, shape index: {}]   ;;  %s1529_s3 = inlined_call_operand.vmem [shape: s32[1,2], index: 3, kind: input, shape index: {}]   ;;  %s1530_s2 = inlined_call_operand.vmem [shape: f32[1,16], index: 2, kind: input, shape index: {}]   ;;  %s1531_s4 = inlined_call_operand.vmem [shape: f32[1,64], index: 4, kind: output, shape index: {}]  }
   0x1   :  { %v1072_v0 = vld [vmem:[%s1527_s0] ss:$0 sm:$0xff]  ;;  %1265 = vmatprep.subr.bf16.mxu0 %v1377_v2  ;;  %1141 = vmatprep.mubr.msk.f32.mxu0 %vm1378_vm1, %v1379_v4  ;;  %v18_v6 = vld [vmem:[%s1528_s1 + $0x8] sm:$0xff]  ;;  %v19_v8 = vld [vmem:[%s1528_s1 + $0x10] sm:$0xff]  ;;  %v1381_v42 = vmov 1   ;;  %v1382_v51 = vmov 0   ;;  %v23_v62 = vlaneseq }
   0x2   :  { %v1415_v1 = vld [vmem:[%s1527_s0] sm:$0x1]  ;;  %548 = vrot.lane.b32.xlu0 %v1072_v0, %s1380_s21  ;;  %v20_v9 = vld [vmem:[%s1528_s1 + $0x18] sm:$0xff]  ;;  %1301 = vmatprep.subr.bf16.mxu1 %v1377_v2  ;;  %v34_v11 = vand.u32 4294901760, %v18_v6  ;;  %v37_v12 = vand.u32 4294901760, %v19_v8  ;;  %vm515_vm2 = vcmask 122880  }
   0x3   :  { %v17_v3 = vld [vmem:[%s1528_s1] sm:$0xff]  ;;  %v28_v5 = vsel %vm26_vm0, %v1415_v1, 0  ;;  %v40_v13 = vand.u32 4294901760, %v20_v9  ;;  %1207 = vmatprep.mubr.msk.f32.mxu1 %vm1378_vm1, %v1379_v4  ;;  %1366 = vset.pattern.permute.xlu1 %v1381_v42  ;;  %vm540_vm5 = vcmask 253952   ;;  %vm1066_vm6 = vcmask 516352  }
   0x4   :  { %v31_v7 = vand.u32 4294901760, %v17_v3  ;;  %v1435_v10 = vand.u32 4294901760, %v28_v5  ;;  %v118_v17 = vsub.f32 %v18_v6, %v34_v11  ;;  %v125_v19 = vsub.f32 %v19_v8, %v37_v12  ;;  %v22_v43 = vld [vmem:[%s1529_s3] sm:$0x1]  ;;  %1367 = vset.pattern.permute.xlu0 %v1382_v51 }
   0x5   :  { %v132_v20 = vsub.f32 %v20_v9, %v40_v13  ;;  %v1443_v21 = vpack.c.bf16 %v40_v13, %v37_v12  ;;  %1047 = vperm.xlu1 %1366, %v22_v43   ;;  %v21_v52 = vld [vmem:[%s1530_s2] sm:$0x1]  ;;  %v24_v9 = vand.u32 127, %v23_v62  ;;  %s1383_s2 = smov 32  }
   0x6   :  { %v111_v14 = vsub.f32 %v17_v3, %v31_v7  ;;  %v100_v15 = vsub.f32 %v28_v5, %v1435_v10  ;;  %v1440_v16 = vpack.c.bf16 %v34_v11, %v31_v7  ;;  %v119_v23 = vand.u32 4294901760, %v118_v17 }
   0x7   :  { %v126_v25 = vand.u32 4294901760, %v125_v19  ;;  %v133_v26 = vand.u32 4294901760, %v132_v20  ;;  %v1281_v39 = vpack.c.bf16 %v132_v20, %v125_v19  ;;  %v529_v5 = vshrl.u32 %v23_v62, 7 }
   0x8   :  { %v112_v18 = vand.u32 4294901760, %v111_v14  ;;  %1267 = vmatpush3.bf16.msra.mxu0 %v1440_v16  ;;  %v101_v22 = vand.u32 4294901760, %v100_v15  ;;  %1303 = vmatpush3.bf16.msra.mxu1 %v1440_v16  ;;  %v120_v28 = vsub.f32 %v118_v17, %v119_v23  ;;  %v1278_v38 = vpack.c.bf16 %v118_v17, %v111_v14 }
   0x9   :  { %1268 = vmatprep.subr.bf16.mxu0 %v1377_v2  ;;  %1304 = vmatprep.subr.bf16.mxu1 %v1377_v2  ;;  %v127_v30 = vsub.f32 %v125_v19, %v126_v25  ;;  %v134_v31 = vsub.f32 %v132_v20, %v133_v26  ;;  %v1293_v41 = vpack.c.bf16 %v133_v26, %v126_v25  ;;  %v530_v7 = vsub.s32 0, %v529_v5 }
   0xa   :  { %v113_v24 = vsub.f32 %v111_v14, %v112_v18  ;;  %v102_v27 = vsub.f32 %v100_v15, %v101_v22  ;;  %v121_v33 = vand.u32 4294901760, %v120_v28  ;;  %v1290_v40 = vpack.c.bf16 %v119_v23, %v112_v18 }
   0xb   :  { %v128_v34 = vand.u32 4294901760, %v127_v30  ;;  %v135_v35 = vand.u32 4294901760, %v134_v31 }
   0xc   :  { %v114_v29 = vand.u32 4294901760, %v113_v24  ;;  %1270 = vmatpush3.bf16.msra.mxu0 %v1443_v21  ;;  %v103_v32 = vand.u32 4294901760, %v102_v27  ;;  %1306 = vmatpush3.bf16.msra.mxu1 %v1443_v21 }
   0xd   :  { %1271 = vmatprep.subr.bf16.mxu0 %v1377_v2  ;;  %1307 = vmatprep.subr.bf16.mxu1 %v1377_v2  ;;  %v1275_v37 = vpack.c.bf16 %v135_v35, %v128_v34 }
   0xe   :  { %v1272_v36 = vpack.c.bf16 %v121_v33, %v114_v29 }
   0xf   :  { %1142 = vmatmul.mubr.f32.vlgmr.msra.gmra.mrb[0].mxu0 %v103_v32 }
  0x10   :  { %1273 = vmatpush3.bf16.msra.mxu0 %v1272_v36  ;;  %1152 = vmatprep.mubr.msk.f32.mxu0 %vm1378_vm1, %v1379_v4 }
  0x11   :  { %1274 = vmatprep.subr.bf16.mxu0 %v1377_v2 }
  0x14   :  { %1276 = vmatpush3.bf16.msra.mxu0 %v1275_v37 }
  0x15   :  { %1277 = vmatprep.subr.bf16.mxu0 %v1377_v2 }
  0x17   :  { %1153 = vmatmul.mubr.f32.vlgmr.msra.gmra.mrb[0].mxu0 %v1435_v10 }
  0x18   :  { %1279 = vmatpush3.bf16.msra.mxu0 %v1278_v38  ;;  %1163 = vmatprep.mubr.msk.f32.mxu0 %vm1378_vm1, %v1379_v4 }
  0x19   :  { %1280 = vmatprep.subr.bf16.mxu0 %v1377_v2 }
  0x1c   :  { %1282 = vmatpush3.bf16.msra.mxu0 %v1281_v39 }
  0x1d   :  { %1283 = vmatprep.subr.bf16.mxu0 %v1377_v2 }
  0x1f   :  { %1164 = vmatmul.mubr.f32.vlgmr.msra.gmra.mrb[0].mxu0 %v100_v15 }
  0x20   :  { %1285 = vmatpush3.bf16.msra.mxu0 %v1440_v16  ;;  %1174 = vmatprep.mubr.msk.f32.mxu0 %vm1378_vm1, %v1379_v4 }
  0x21   :  { %1286 = vmatprep.subr.bf16.mxu0 %v1377_v2 }
  0x24   :  { %1288 = vmatpush3.bf16.msra.mxu0 %v1443_v21 }
  0x25   :  { %1289 = vmatprep.subr.bf16.mxu0 %v1377_v2 }
  0x27   :  { %1175 = vmatmul.mubr.f32.vlgmr.msra.gmra.mrb[0].mxu0 %v101_v22 }
  0x28   :  { %1291 = vmatpush3.bf16.msra.mxu0 %v1290_v40  ;;  %1185 = vmatprep.mubr.msk.f32.mxu0 %vm1378_vm1, %v1379_v4 }
  0x29   :  { %1292 = vmatprep.subr.bf16.mxu0 %v1377_v2 }
  0x2c   :  { %1294 = vmatpush3.bf16.msra.mxu0 %v1293_v41 }
  0x2d   :  { %1295 = vmatprep.subr.bf16.mxu0 %v1377_v2 }
  0x2f   :  { %1186 = vmatmul.mubr.f32.vlgmr.msra.gmra.mrb[0].mxu0 %v1435_v10 }
  0x30   :  { %1297 = vmatpush3.bf16.msra.mxu0 %v1440_v16  ;;  %1196 = vmatprep.mubr.msk.f32.mxu0 %vm1378_vm1, %v1379_v4 }
  0x31   :  { %1298 = vmatprep.subr.bf16.mxu0 %v1377_v2 }
  0x34   :  { %1300 = vmatpush3.bf16.msra.mxu0 %v1443_v21 }
  0x37   :  { %1197 = vmatmul.mubr.f32.vlgmr.msra.gmra.mrb[0].mxu0 %v1435_v10 }
  0x74   :  { %v1482_v44 = vpop.permute.xlu0 %548 }
  0x75   :  { %v550_v45 = vsel %vm26_vm0, %v1482_v44, 0 }
  0x76   :  { %v621_v46 = vand.u32 4294901760, %v550_v45 }
  0x78   :  { %v622_v47 = vsub.f32 %v550_v45, %v621_v46 }
  0x7a   :  { %v623_v48 = vand.u32 4294901760, %v622_v47 }
  0x7c   :  { %v624_v49 = vsub.f32 %v622_v47, %v623_v48 }
  0x7e   :  { %v625_v50 = vand.u32 4294901760, %v624_v49 }
  0x80   :  { %1208 = vmatmul.mubr.f32.vlgmr.msra.gmra.mrb[0].mxu1 %v625_v50 }
  0x81   :  { %1309 = vmatpush3.bf16.msra.mxu1 %v1272_v36  ;;  %1218 = vmatprep.mubr.msk.f32.mxu1 %vm1378_vm1, %v1379_v4 }
  0x82   :  { %1310 = vmatprep.subr.bf16.mxu1 %v1377_v2 }
  0x84   :  { %v1048_v61 = vpop.permute.xlu1 %1047 }
  0x85   :  { %1312 = vmatpush3.bf16.msra.mxu1 %v1275_v37  ;;  %v1052_v8 = vrot.slane %v1048_v61, %v530_v7 }
  0x86   :  { %1313 = vmatprep.subr.bf16.mxu1 %v1377_v2 }
  0x87   :  { %vm1053_vm3 = vcmp.eq.s32.totalorder %v24_v9, %v1052_v8 }
  0x88   :  { %1219 = vmatmul.mubr.f32.vlgmr.msra.gmra.mrb[0].mxu1 %v621_v46 }
  0x89   :  { %1315 = vmatpush3.bf16.msra.mxu1 %v1278_v38  ;;  %1229 = vmatprep.mubr.msk.f32.mxu1 %vm1378_vm1, %v1379_v4 }
  0x8a   :  { %1316 = vmatprep.subr.bf16.mxu1 %v1377_v2 }
  0x8d   :  { %1318 = vmatpush3.bf16.msra.mxu1 %v1281_v39 }
  0x8e   :  { %1319 = vmatprep.subr.bf16.mxu1 %v1377_v2 }
  0x90   :  { %1230 = vmatmul.mubr.f32.vlgmr.msra.gmra.mrb[0].mxu1 %v622_v47 }
  0x91   :  { %1321 = vmatpush3.bf16.msra.mxu1 %v1440_v16  ;;  %1240 = vmatprep.mubr.msk.f32.mxu1 %vm1378_vm1, %v1379_v4 }
  0x92   :  { %1322 = vmatprep.subr.bf16.mxu1 %v1377_v2 }
  0x95   :  { %1324 = vmatpush3.bf16.msra.mxu1 %v1443_v21 }
  0x96   :  { %1325 = vmatprep.subr.bf16.mxu1 %v1377_v2 }
  0x98   :  { %1241 = vmatmul.mubr.f32.vlgmr.msra.gmra.mrb[0].mxu1 %v623_v48 }
  0x99   :  { %1327 = vmatpush3.bf16.msra.mxu1 %v1290_v40  ;;  %1251 = vmatprep.mubr.msk.f32.mxu1 %vm1378_vm1, %v1379_v4 }
  0x9a   :  { %1328 = vmatprep.subr.bf16.mxu1 %v1377_v2 }
  0x9d   :  { %1330 = vmatpush3.bf16.msra.mxu1 %v1293_v41 }
  0x9e   :  { %1331 = vmatprep.subr.bf16.mxu1 %v1377_v2 }
  0xa0   :  { %1252 = vmatmul.mubr.f32.vlgmr.msra.gmra.mrb[0].mxu1 %v621_v46 }
  0xa1   :  { %1333 = vmatpush3.bf16.msra.mxu1 %v1440_v16  ;;  %1262 = vmatprep.mubr.msk.f32.mxu1 %vm1378_vm1, %v1379_v4 }
  0xa2   :  { %1334 = vmatprep.subr.bf16.mxu1 %v1377_v2 }
  0xa5   :  { %1336 = vmatpush3.bf16.msra.mxu1 %v1443_v21 }
  0xa8   :  { %1263 = vmatmul.mubr.f32.vlgmr.msra.gmra.mrb[0].mxu1 %v621_v46 }
 0x10a   :  { %v511_v53 = vpop.f32.mrb[0].mxu0 }
 0x10b   :  { %v1337_v54 = vadd.f32 %v511_v53, %v21_v52  ;;  %v1198_v55 = vpop.f32.mrb[1].mxu0 }
 0x10d   :  { %v516_v56 = vsel %vm515_vm2, %v1337_v54, -inf }
 0x10e   :  { %517 = vmax.xlane.f32.xlu1 %v516_v56 }
 0x17b   :  { %v1033_v57 = vpop.f32.mrb[0].mxu1 }
 0x17c   :  { %v1338_v58 = vadd.f32 %v1033_v57, %v21_v52  ;;  %v1264_v59 = vpop.f32.mrb[1].mxu1 }
 0x17e   :  { %v1037_v60 = vsel %vm515_vm2, %v1338_v58, -inf }
 0x17f   :  { %1038 = vmax.xlane.f32.xlu0 %v1037_v60 }
 0x195   :  { %526 = vperm.xlu0 %1367, %v22_v43  }
 0x199   :  { %1368 = vset.pattern.permute.xlu0 %v1381_v42 }
 0x19b   :  { %v518_v63 = vpop.xlane.xlu1 %517 }
 0x19c   :  { %v519_v3 = vsub.f32 %v1337_v54, %v518_v63 }
 0x19e   :  { %v520_v6 = vmul.f32 1.442695, %v519_v3 }
 0x20c   :  { %v1039_v0 = vpop.xlane.xlu0 %1038 }
 0x20d   :  { %v1040_v2 = vsub.f32 %v1338_v58, %v1039_v0 }
 0x20f   :  { %v1041_v4 = vmul.f32 1.442695, %v1040_v2 }
 0x211   :  { %1369 = vpow2.f32 %v1041_v4 }
 0x212   :  { %1371 = vpow2.f32 %v520_v6 }
 0x214   :  { %v527_v11 = vpop.permute.xlu0 %526 }
 0x215   :  { %v531_v14 = vrot.slane %v527_v11, %v530_v7 }
 0x217   :  { %vm532_vm4 = vcmp.eq.s32.totalorder %v24_v9, %v531_v14 }
 0x21b   :  { %v1370_v10 = vpop.eup %1369 }
 0x21c   :  { %v1043_v12 = vsel %vm515_vm2, %v1370_v10, 0.0  ;;  %v1054_v13 = vsel %vm1053_vm3, %v1370_v10, 0.0  ;;  %v1372_v16 = vpop.eup %1371 }
 0x21d   :  { %1044 = vadd.xlane.f32.xlu1 %v1043_v12  ;;  %v1055_v15 = vsel %vm515_vm2, %v1054_v13, 0.0  ;;  %v522_v17 = vsel %vm515_vm2, %v1372_v16, 0.0  ;;  %v533_v18 = vsel %vm532_vm4, %v1372_v16, 0.0 }
 0x21e   :  { %v534_v19 = vsel %vm515_vm2, %v533_v18, 0.0 }
 0x221   :  { %1056 = vadd.xlane.f32.xlu1 %v1055_v15 }
 0x225   :  { %523 = vadd.xlane.f32.xlu1 %v522_v17 }
 0x229   :  { %535 = vadd.xlane.f32.xlu1 %v534_v19 }
 0x2aa   :  { %v1045_v20 = vpop.xlane.xlu1 %1044 }
 0x2ab   :  { %1373 = vrcp.f32 %v1045_v20 }
 0x2ae   :  { %v1057_v21 = vpop.xlane.xlu1 %1056 }
 0x2b2   :  { %v524_v22 = vpop.xlane.xlu1 %523 }
 0x2b3   :  { %1375 = vrcp.f32 %v524_v22 }
 0x2b5   :  { %v1374_v23 = vpop.eup %1373 }
 0x2b6   :  { %v1059_v24 = vmul.f32 %v1374_v23, %v1057_v21  ;;  %v536_v27 = vpop.xlane.xlu1 %535 }
 0x2b8   :  { %v1061_v25 = vmul.f32 %v1059_v24, %v1482_v44 }
 0x2ba   :  { %1063 = vrot.lane.b32.xlu1 %v1061_v25, %s1383_s2 }
 0x2bd   :  { %v1376_v26 = vpop.eup %1375 }
 0x2be   :  { %v538_v28 = vmul.f32 %v1376_v26, %v536_v27 }
 0x2c0   :  { %v539_v29 = vmul.f32 %v538_v28, %v1415_v1 }
 0x2c2   :  { %541 = vst.msk [vmem:[%s1531_s4] sm:$0x1] %vm540_vm5, %v539_v29 }
 0x32c   :  { %v1064_v30 = vpop.permute.xlu1 %1063 }
 0x32d   :  { %1067 = vst.msk [vmem:[%s1531_s4] sm:$0x1] %vm1066_vm6, %v1064_v30 }

</bundles_post_ra>
